<compile_context>
chip_gen: v7x
topology: tpu7x:2x2x1
jax: 0.10.0
libtpu: 0.0.40
codegen_flags: <defaults>
</compile_context>

<pallas_src>
import jax
import jax.numpy as jnp
from jax import lax
from jax.experimental import pallas as pl
from jax.experimental.pallas import tpu as pltpu

_MAX_TILE_M = 8192            # keeps double-buffered tiles << v7x's 64 MiB VMEM


def _round_up(x, m):
    return (x + m - 1) // m * m


def _gemm_bias_kernel(p_ref, w_ref, b_ref, o_ref):
    # One (tile_m, K) @ (K, C_out) MXU matmul per grid step, f32 accumulation,
    # bias add fused, bf16 store. Weight/bias blocks are grid-invariant
    # (resident in VMEM); only patches and output stream (double-buffered).
    acc = jnp.dot(p_ref[...], w_ref[...], preferred_element_type=jnp.float32)
    o_ref[...] = (acc + b_ref[...]).astype(o_ref.dtype)


def patch_merge_forward(x, weight, bias, *, stride, padding, tile_m=2048):
    """x: (B, C_in, H, W) f32; weight: (C_out, C_in, KH, KW); bias: (C_out,)."""
    B, C_in, H, W = x.shape
    C_out, _, KH, KW = weight.shape
    H_out = (H + 2 * padding - KH) // stride + 1
    W_out = (W + 2 * padding - KW) // stride + 1
    M = B * H_out * W_out
    K = C_in * KH * KW

    # ---- glue: patch extraction WITHOUT a gather HLO or explicit transpose --
    # Identity-kernel grouped conv; out spec "NHWC" puts the flattened patch
    # features last, so no jnp.transpose pass is needed. Feature ordering is
    # (C_in, KH, KW) with KW fastest, matching weight.reshape(C_out, K).
    # Cast to bf16 up front so both the patches intermediate and the kernel's
    # input stream are half-width (MXU-native).
    x_bf16 = x.astype(jnp.bfloat16)
    patches = lax.conv_general_dilated_patches(
        x_bf16,
        filter_shape=(KH, KW),
        window_strides=(stride, stride),
        padding=[(padding, padding), (padding, padding)],
        dimension_numbers=("NCHW", "OIHW", "NHWC"),
    )  # (B, H_out, W_out, K), bf16
    patches = patches.reshape(M, K)

    # ---- M tiling: minimize padding, force >=2 steps when M is large --------
    tile_m = max(16, min(tile_m, _MAX_TILE_M))
    n_steps = max(1, pl.cdiv(M, tile_m))
    if n_steps == 1 and M >= 1024:
        n_steps = 2            # let dimension_semantics split M on v7x's 2 TCs
    tile_m_eff = _round_up(pl.cdiv(M, n_steps), 16)
    M_pad = tile_m_eff * n_steps
    if M_pad != M:
        # Padded rows become (0-patch @ W + bias); sliced off below — do not
        # switch to input_output_aliases / in-place accumulation without
        # re-checking this.
        patches = jnp.pad(patches, ((0, M_pad - M), (0, 0)))

    # weight (C_out, C_in, KH, KW) -> (K, C_out); bias f32 row vector.
    w_mat = weight.reshape(C_out, K).T.astype(jnp.bfloat16)
    b_mat = bias.astype(jnp.float32).reshape(1, C_out)

    cost = pl.CostEstimate(
        flops=2 * M_pad * K * C_out,
        transcendentals=0,
        bytes_accessed=(M_pad * K * 2          # patches (bf16)
                        + K * C_out * 2        # weight (bf16)
                        + C_out * 4            # bias (f32)
                        + M_pad * C_out * 2),  # output (bf16)
    )

    out = pl.pallas_call(
        _gemm_bias_kernel,
        out_shape=jax.ShapeDtypeStruct((M_pad, C_out), jnp.bfloat16),
        grid=(n_steps,),
        in_specs=[
            pl.BlockSpec((tile_m_eff, K), lambda i: (i, 0)),   # streamed patches
            pl.BlockSpec((K, C_out), lambda i: (0, 0)),        # resident weight
            pl.BlockSpec((1, C_out), lambda i: (0, 0)),        # resident bias
        ],
        out_specs=pl.BlockSpec((tile_m_eff, C_out), lambda i: (i, 0)),
        compiler_params=pltpu.CompilerParams(
            dimension_semantics=("parallel",),   # shards M across v7x's 2 TCs
            vmem_limit_bytes=48 * 1024 * 1024,   # safe ceiling even on 64 MiB v7x
        ),
        cost_estimate=cost,
    )(patches, w_mat, b_mat)

    # ---- glue: drop M padding, back to NCHW f32 (module semantics) ----------
    out = out[:M].reshape(B, H_out, W_out, C_out)
    return jnp.transpose(out, (0, 3, 1, 2)).astype(jnp.float32)


if __name__ == "__main__":
    # Module defaults: patch_size=7, in_chans=3, embed_dim=64, stride=4, padding=2.
    patch_size, in_chans, embed_dim, stride, padding = 7, 3, 64, 4, 2
    B, H, W = 2, 16, 16

    key = jax.random.PRNGKey(0)
    kx, kw, kb = jax.random.split(key, 3)
    x = jax.random.normal(kx, (B, in_chans, H, W), dtype=jnp.float32)
    weight = 0.05 * jax.random.normal(
        kw, (embed_dim, in_chans, patch_size, patch_size), dtype=jnp.float32)
    bias = 0.02 * jax.random.normal(kb, (embed_dim,), dtype=jnp.float32)

    y = jax.block_until_ready(
        patch_merge_forward(x, weight, bias, stride=stride, padding=padding))

    conv_kwargs = dict(
        window_strides=(stride, stride),
        padding=[(padding, padding), (padding, padding)],
        dimension_numbers=("NCHW", "OIHW", "NCHW"),
    )
    # Reference 1: matched operand precision (bf16 operands, f32 accumulation).
    # Also guards the (C_in, KH, KW)-with-KW-fastest feature ordering of
    # conv_general_dilated_patches, which the im2col GEMM relies on.
    ref_bf16 = lax.conv_general_dilated(
        x.astype(jnp.bfloat16), weight.astype(jnp.bfloat16),
        preferred_element_type=jnp.float32, **conv_kwargs,
    ) + bias[None, :, None, None]
    # Reference 2: full-f32 conv (semantics check; loose tol covers bf16 casts).
    ref_f32 = lax.conv_general_dilated(x, weight, **conv_kwargs) \
        + bias[None, :, None, None]

    assert y.shape == ref_f32.shape, (y.shape, ref_f32.shape)
    # Kernel output is bf16 (cast after f32 accumulate + bias), so allow the
    # extra output-rounding term on top of the bf16-operand error.
    assert jnp.allclose(y, ref_bf16, atol=1e-2, rtol=1e-2), \
        float(jnp.max(jnp.abs(y - ref_bf16)))
    assert jnp.allclose(y, ref_f32, atol=6e-2, rtol=6e-2), \
        float(jnp.max(jnp.abs(y - ref_f32)))

    print("KERNEL_OK")
</pallas_src>

<mosaic_0001>
module attributes {stable_mosaic.version = 11 : i64} {
  func.func @_gemm_bias_kernel(%arg0: i32, %arg1: memref<32x147xbf16, #tpu.memory_space<vmem>>, %arg2: memref<147x64xbf16, #tpu.memory_space<vmem>>, %arg3: memref<1x64xf32, #tpu.memory_space<vmem>>, %arg4: memref<32x64xbf16, #tpu.memory_space<vmem>>) attributes {dimension_semantics = [#tpu.dimension_semantics<parallel>], iteration_bounds = array<i64: 1>, scalar_prefetch = 0 : i64, scratch_operands = 0 : i64, tpu.core_type = #tpu.core_type<tc>, window_params = [{transform_indices = @transform_0, window_bounds = array<i64: 32, 147>}, {pipeline_mode = #tpu.pipeline_mode<synchronous>, transform_indices = @transform_1, window_bounds = array<i64: 147, 64>}, {pipeline_mode = #tpu.pipeline_mode<synchronous>, transform_indices = @transform_2, window_bounds = array<i64: 1, 64>}, {transform_indices = @transform_3, window_bounds = array<i64: 32, 64>}]} {
    %c0 = arith.constant 0 : index
    %c0_0 = arith.constant 0 : index
    %0 = vector.load %arg1[%c0, %c0_0] : memref<32x147xbf16, #tpu.memory_space<vmem>>, vector<32x147xbf16>
    %c0_1 = arith.constant 0 : index
    %c0_2 = arith.constant 0 : index
    %1 = vector.load %arg2[%c0_1, %c0_2] : memref<147x64xbf16, #tpu.memory_space<vmem>>, vector<147x64xbf16>
    %cst = arith.constant dense<0.000000e+00> : vector<32x64xf32>
    %2 = tpu.matmul %0, %1, %cst {dimension_numbers = #tpu.dot_dimension_numbers<[1], [0], [0], [1], [0, 0, 1, 1], [], []>} : vector<32x147xbf16>, vector<147x64xbf16>, vector<32x64xf32> -> vector<32x64xf32>
    %c0_3 = arith.constant 0 : index
    %c0_4 = arith.constant 0 : index
    %3 = vector.load %arg3[%c0_3, %c0_4] : memref<1x64xf32, #tpu.memory_space<vmem>>, vector<1x64xf32>
    %4 = vector.broadcast %3 : vector<1x64xf32> to vector<32x64xf32>
    %5 = arith.addf %2, %4 : vector<32x64xf32>
    %6 = arith.truncf %5 : vector<32x64xf32> to vector<32x64xbf16>
    %c0_5 = arith.constant 0 : index
    %c0_6 = arith.constant 0 : index
    %7 = vector.load %arg4[%c0_5, %c0_6] : memref<32x64xbf16, #tpu.memory_space<vmem>>, vector<32x64xbf16>
    tpu.vector_store %arg4[%c0_5, %c0_6], %6 {strides = array<i32>} : memref<32x64xbf16, #tpu.memory_space<vmem>>, vector<32x64xbf16>,
    return
  }
  func.func @transform_0(%arg0: i32) -> (i32, i32) {
    %c0_i32 = arith.constant 0 : i32
    %c0_i32_0 = arith.constant 0 : i32
    return %arg0, %c0_i32 : i32, i32
  }
  func.func @transform_1(%arg0: i32) -> (i32, i32) {
    %c0_i32 = arith.constant 0 : i32
    %c0_i32_0 = arith.constant 0 : i32
    %c0_i32_1 = arith.constant 0 : i32
    return %c0_i32, %c0_i32_0 : i32, i32
  }
  func.func @transform_2(%arg0: i32) -> (i32, i32) {
    %c0_i32 = arith.constant 0 : i32
    %c0_i32_0 = arith.constant 0 : i32
    %c0_i32_1 = arith.constant 0 : i32
    return %c0_i32, %c0_i32_0 : i32, i32
  }
  func.func @transform_3(%arg0: i32) -> (i32, i32) {
    %c0_i32 = arith.constant 0 : i32
    %c0_i32_0 = arith.constant 0 : i32
    return %arg0, %c0_i32 : i32, i32
  }
}

</mosaic_0001>

<bundles_post_ra>
// kernel: tpu_custom_call.1
= control target key start
LH: loop header
LB: loop body
LE: loop exit
PB: predicated region body
PF: predicated region fallthrough
CT: control target
= control target key end

     0   :  { %v311_v1 = vmov 0   ;;  %vm121_vm0 = vcmask 154624   ;;  %s393_s0 = inlined_call_operand.vmem [shape: bf16[32,147], index: 0, kind: input, shape index: {}]   ;;  %s394_s1 = inlined_call_operand.vmem [shape: bf16[147,64], index: 1, kind: input, shape index: {}]   ;;  %s395_s2 = inlined_call_operand.vmem [shape: f32[1,64], index: 2, kind: input, shape index: {}]   ;;  %s396_s3 = inlined_call_operand.hbm [shape: bf16[32,64], index: 3, kind: output, shape index: {}]  }
   0x1   :  { %v271_v0 = vld [vmem:[%s394_s1] sm:$0xff]   ;;  %135 = vmatprep.subr.bf16.mxu0 %v311_v1  ;;  %246 = vmatprep.subr.bf16.mxu1 %v311_v1  ;;  %v272_v2 = vld [vmem:[%s394_s1 + $0x8] sm:$0xff]   ;;  %v273_v3 = vld [vmem:[%s394_s1 + $0x10] sm:$0xff]  }
   0x2   :  { %136 = vmatpush1.bf16.msra.mxu0 %v271_v0  ;;  %256 = vmatpush1.bf16.msra.mxu1 %v271_v0  ;;  %v274_v4 = vld [vmem:[%s394_s1 + $0x18] sm:$0xff]   ;;  %v283_v5 = vld [vmem:[%s393_s0 + $0x4] ss:$8 sps:$4 sm:$0xff]  }
   0x3   :  { %137 = vmatprep.subr.bf16.mxu0 %v311_v1  ;;  %247 = vmatprep.subr.bf16.mxu1 %v311_v1  ;;  %v286_v6 = vld [vmem:[%s393_s0 + $0x14] ss:$8 sps:$4 sm:$0xff]  }
   0x4   :  { %236 = vmatprep.mubr.msk.bf16.mxu0 %vm121_vm0, %v283_v5 }
   0x6   :  { %138 = vmatpush1.bf16.msra.mxu0 %v272_v2  ;;  %257 = vmatpush1.bf16.msra.mxu1 %v272_v2 }
   0x7   :  { %139 = vmatprep.subr.bf16.mxu0 %v311_v1  ;;  %248 = vmatprep.subr.bf16.mxu1 %v311_v1 }
   0xa   :  { %140 = vmatpush1.bf16.msra.mxu0 %v273_v3  ;;  %258 = vmatpush1.bf16.msra.mxu1 %v273_v3 }
   0xb   :  { %141 = vmatprep.subr.bf16.mxu0 %v311_v1  ;;  %249 = vmatprep.subr.bf16.mxu1 %v311_v1 }
   0xc   :  { %8 = vsyncpa [#allocation3], 0  ;;  %v275_v7 = vld [vmem:[%s394_s1 + $0x20] sm:$0xff]   ;;  %237 = vmatprep.mubr.msk.bf16.mxu1 %vm121_vm0, %v286_v6  ;;  %v276_v8 = vld [vmem:[%s394_s1 + $0x28] sm:$0xff]   ;;  %vm128_vm1 = vcmask 1040384   ;;  %vm129_vm2 = vcmask 1041408  }
   0xd   :  { %v277_v9 = vld [vmem:[%s394_s1 + $0x30] sm:$0xff]   ;;  %v278_v10 = vld [vmem:[%s394_s1 + $0x38] sm:$0xff]   ;;  %v312_v11 = vmov 65535   ;;  %v279_v13 = vld [vmem:[%s394_s1 + $0x40] sm:$0xff]   ;;  %s313_s14 = smov [#allocation2]   ;;  %vm200_vm3 = vcmask 519168  }
   0xe   :  { %142 = vmatpush1.bf16.msra.mxu0 %v274_v4  ;;  %259 = vmatpush1.bf16.msra.mxu1 %v274_v4  ;;  %v130_v12 = vsel %vm128_vm1, 4294967295, %v312_v11  ;;  %v280_v14 = vld [vmem:[%s394_s1 + $0x48] ss:$0 sps:$4 sm:$0x33]   ;;  %v284_v18 = vld [vmem:[%s393_s0 + $0x10] ss:$8 sps:$4 sm:$0xff]  }
   0xf   :  { %143 = vmatprep.subr.bf16.mxu0 %v311_v1  ;;  %250 = vmatprep.subr.bf16.mxu1 %v311_v1  ;;  %v131_v15 = vsel %vm129_vm2, %v130_v12, 0  ;;  %v281_v17 = vld [vmem:[%s393_s0] ss:$8 sps:$4 sm:$0xff]   ;;  %s210_s15 = sshll.u32 %s313_s14, 4  ;;  %s211_s15 = int_to_ptr.vmem [resolvable:$true] %s210_s15 }
  0x10   :  { %v133_v16 = vand.u32 %v280_v14, %v131_v15  ;;  %v221_v19 = vld [vmem:[%s395_s2] ss:$0 sm:$0xff]  ;;  %s287_s0 = scalar_lea.vmem %s211_s15, 256  ;;  %p292_p1 = scmp.lt.s32.totalorder %s211_s15, %s211_s15 }
  0x11   :  { %p288_p0 = scmp.ne.s32.totalorder %s211_s15, %s287_s0  ;;  %p293_p2 = scmp.lt.s32.totalorder %s287_s0, %s287_s0 }
  0x12   :  { %144 = vmatpush1.bf16.msra.mxu0 %v275_v7  ;;  %260 = vmatpush1.bf16.msra.mxu1 %v275_v7 }
  0x13   :  { %145 = vmatprep.subr.bf16.mxu0 %v311_v1  ;;  %251 = vmatprep.subr.bf16.mxu1 %v311_v1  ;;  %p294_p3 = por %p293_p2, %p292_p1 }
  0x15   :  { %p295_p4 = pnand %p294_p3, %p288_p0 }
  0x16   :  { %146 = vmatpush1.bf16.msra.mxu0 %v276_v8  ;;  %261 = vmatpush1.bf16.msra.mxu1 %v276_v8 }
  0x17   :  { %147 = vmatprep.subr.bf16.mxu0 %v311_v1  ;;  %252 = vmatprep.subr.bf16.mxu1 %v311_v1 }
  0x1a   :  { %148 = vmatpush1.bf16.msra.mxu0 %v277_v9  ;;  %262 = vmatpush1.bf16.msra.mxu1 %v277_v9 }
  0x1b   :  { %149 = vmatprep.subr.bf16.mxu0 %v311_v1  ;;  %253 = vmatprep.subr.bf16.mxu1 %v311_v1 }
  0x1e   :  { %150 = vmatpush1.bf16.msra.mxu0 %v278_v10  ;;  %263 = vmatpush1.bf16.msra.mxu1 %v278_v10 }
  0x1f   :  { %151 = vmatprep.subr.bf16.mxu0 %v311_v1  ;;  %254 = vmatprep.subr.bf16.mxu1 %v311_v1 }
  0x22   :  { %152 = vmatpush1.bf16.msra.mxu0 %v279_v13  ;;  %264 = vmatpush1.bf16.msra.mxu1 %v279_v13 }
  0x23   :  { %153 = vmatprep.subr.bf16.mxu0 %v311_v1  ;;  %255 = vmatprep.subr.bf16.mxu1 %v311_v1 }
  0x26   :  { %154 = vmatpush1.bf16.msra.mxu0 %v133_v16  ;;  %265 = vmatpush1.bf16.msra.mxu1 %v133_v16 }
  0x29   :  { %168 = vmatmul.mubr.bf16.vlgmr.msra.gmra.mrb[0].mxu0 %v281_v17  ;;  %176 = vmatmul.mubr.bf16.vlgmr.msra.gmra.mrb[0].mxu1 %v284_v18 }
  0xfc   :  { %v169_v20 = vpop.f32.mrb[0].mxu0  ;;  %v177_v21 = vpop.f32.mrb[0].mxu1 }
  0xfd   :  { %v170_v22 = vadd.f32 %v221_v19, %v169_v20  ;;  %v178_v23 = vadd.f32 %v221_v19, %v177_v21  ;;  %v171_v24 = vpop.f32.mrb[1].mxu0  ;;  %v179_v25 = vpop.f32.mrb[1].mxu1 }
  0xfe   :  { %v172_v26 = vpop.f32.mrb[2].mxu0  ;;  %v180_v27 = vpop.f32.mrb[2].mxu1 }
  0xff   :  { %v242_v28 = vpack.c.bf16 %v170_v22, %v170_v22  ;;  %v244_v29 = vpack.c.bf16 %v178_v23, %v178_v23  ;;  %v173_v30 = vadd.f32 %v221_v19, %v172_v26  ;;  %v181_v31 = vadd.f32 %v221_v19, %v180_v27  ;;  %v174_v32 = vpop.f32.mrb[3].mxu0  ;;  %v182_v33 = vpop.f32.mrb[3].mxu1 }
 0x101   :  { %201 = vst.msk [vmem:[#allocation2] sm:$0xf] %vm200_vm3, %v242_v28  ;;  %203 = vst.msk [vmem:[#allocation2 + $0x8] sm:$0xf] %vm200_vm3, %v244_v29  ;;  %v243_v34 = vpack.c.bf16 %v173_v30, %v173_v30  ;;  %v245_v35 = vpack.c.bf16 %v181_v31, %v181_v31 }
 0x103   :  { %202 = vst.msk [vmem:[#allocation2 + $0x4] sm:$0xf] %vm200_vm3, %v243_v34  ;;  %204 = vst.msk [vmem:[#allocation2 + $0xc] sm:$0xf] %vm200_vm3, %v245_v35 }
 0x104   :  { %298 = shalt.err (!%p295_p4)
}
 0x105   :  { %s299_s17 = scalar_lea.hbm %s396_s3, 256 }
 0x106   :  { %p300_p5 = scmp.ne.s32.totalorder %s396_s3, %s299_s17  ;;  %p303_p6 = scmp.lt.u32.totalorder %s299_s17, %s396_s3 }
 0x108   :  { %p305_p7 = pnand %p303_p6, %p300_p5 }
 0x10a   :  { %308 = shalt.err (!%p305_p7)
}
 0x10b   :  { %s314_s22 = smov 64   ;;  %s315_s23 = smov 4  }
 0x10c   :  { %216 = dma.vmem_to_hbm [thread:$0]  %s211_s15, 256, %s396_s3, [#allocation3], %s314_s22, %s314_s22, %s315_s23  }
 0x10d   :  { %309 = dma.done.wait [#allocation3], 256  }
 0x10e   :  { %310 = vsyncadd [#allocation3], 4294967040 }
 0x10f   :  { %220 = vsyncpa [#allocation3], 1 }

</bundles_post_ra>
